<compile_context>
chip_gen: v7x
topology: tpu7x:2x2x1
jax: 0.10.0
libtpu: 0.0.40
codegen_flags: <defaults>
</compile_context>

<pallas_src>
import functools

import jax
import jax.numpy as jnp
from jax.experimental import pallas as pl
from jax.experimental.pallas import tpu as pltpu


def _round_up(x, m):
    return ((x + m - 1) // m) * m


def _ce_kernel(n_total, logits_ref, targets_ref, out_ref):
    # logits_ref : [T, C]  native dtype (rows of the batch, untransposed HBM)
    # targets_ref: [1, T]  int32
    # out_ref    : [1, 128] f32 -- this tile's masked partial loss sum,
    #                             broadcast across all 128 lanes.
    t, c = logits_ref.shape
    x = logits_ref[...]                                            # [T, C]
    targets = targets_ref[...]                                     # [1, T]

    # ---- relayout [T, C] -> [C, T] on the (idle) MXU via an identity matmul.
    # xt[cls, ex] = sum_k eye[cls, k] * x[ex, k] = x[ex, cls]  (exact copy for
    # 0/1 weights; HIGHEST keeps f32 logits at full precision).
    rows = jax.lax.broadcasted_iota(jnp.int32, (c, c), 0)
    cols = jax.lax.broadcasted_iota(jnp.int32, (c, c), 1)
    eye = (rows == cols).astype(x.dtype)                           # [C, C]
    precision = (jax.lax.Precision.HIGHEST
                 if x.dtype == jnp.float32 else jax.lax.Precision.DEFAULT)
    xt = jax.lax.dot_general(
        eye, x,
        dimension_numbers=(((1,), (1,)), ((), ())),                # eye @ x^T
        preferred_element_type=jnp.float32,
        precision=precision)                                       # [C, T] f32

    # ---- numerically stable log-sum-exp over classes (sublane reductions) --
    col_max = jnp.max(xt, axis=0, keepdims=True)                   # [1, T]
    shifted = xt - col_max                                         # [C, T]
    sum_exp = jnp.sum(jnp.exp(shifted), axis=0, keepdims=True)     # [1, T]

    # One-hot target gather fused into the shifted pass (col_max cancels):
    #   loss = log(sum_exp) - shifted[target]
    class_ids = jax.lax.broadcasted_iota(jnp.int32, (c, t), 0)     # [C, T]
    tgt_shift = jnp.sum(jnp.where(class_ids == targets, shifted, 0.0),
                        axis=0, keepdims=True)                     # [1, T]

    per_ex = jnp.log(sum_exp) - tgt_shift                          # [1, T]

    # ---- mask the ragged tail (compile-time N, no wrapper padding). --------
    # `where` is a select, so garbage (even NaN/Inf) from the clipped final
    # block cannot leak into the sum.
    start = pl.program_id(0) * t
    pos = start + jax.lax.broadcasted_iota(jnp.int32, (1, t), 1)   # [1, T]
    per_ex = jnp.where(pos < n_total, per_ex, 0.0)

    # ---- per-tile partial sum, written as a lane-dense [1, 128] block. -----
    tile_sum = jnp.sum(per_ex)                                     # scalar
    out_ref[...] = jnp.full((1, 128), tile_sum, dtype=jnp.float32)


def cross_entropy_loss(y_pre, y_true, tile_n=16384):
    """y_pre: [N, C] logits (f32 or bf16), y_true: [N] integer labels.

    Returns the scalar mean cross-entropy loss (f32), matching
    torch.nn.CrossEntropyLoss() with default 'mean' reduction
    (i.e. Myloss.forward).
    """
    n, c = y_pre.shape
    targets = y_true.astype(jnp.int32).reshape(1, n)     # free relayout, tiny

    # Batch tile (rows of y_pre). Always a multiple of 128 so the targets /
    # output lane dims stay aligned; for tiny batches use one full-array
    # block (block_shape == array shape is always legal).
    tile_n = max(128, _round_up(int(tile_n), 128))
    if n <= 128:
        tile_n = n
    else:
        # >= 2 tiles whenever possible so the "parallel" axis can split
        # across the two TensorCores on v7x.
        tile_n = min(tile_n, _round_up(pl.cdiv(n, 2), 128))
    num_tiles = pl.cdiv(n, tile_n)

    kernel = functools.partial(_ce_kernel, n)

    partial_sums = pl.pallas_call(
        kernel,
        out_shape=jax.ShapeDtypeStruct((1, num_tiles * 128), jnp.float32),
        grid=(num_tiles,),
        in_specs=[
            # Untransposed, unpadded logits rows in their native dtype.
            pl.BlockSpec((tile_n, c), lambda i: (i, 0)),
            pl.BlockSpec((1, tile_n), lambda i: (0, i)),
        ],
        out_specs=pl.BlockSpec((1, 128), lambda i: (0, i)),
        compiler_params=pltpu.CompilerParams(
            dimension_semantics=("parallel",),   # independent tiles -> 2-TC v7x
            vmem_limit_bytes=32 * 1024 * 1024,
        ),
    )(y_pre, targets)

    # Each tile broadcast its partial sum across its 128 output lanes; take
    # lane 0 of every tile.  Divisor is the true N (tail already masked).
    per_tile = partial_sums.reshape(num_tiles, 128)[:, 0]
    return jnp.sum(per_tile) / n


if __name__ == "__main__":
    key = jax.random.PRNGKey(0)
    k1, k2, k3, k4 = jax.random.split(key, 4)

    # --- MNIST-like small case: batch=8, 10 classes, f32, single block. -----
    N, C = 8, 10
    y_pre = jax.random.normal(k1, (N, C), dtype=jnp.float32)
    y_true = jax.random.randint(k2, (N,), 0, C, dtype=jnp.int32)

    loss = cross_entropy_loss(y_pre, y_true)
    jax.block_until_ready(loss)

    lse = jax.scipy.special.logsumexp(y_pre, axis=-1)
    ref = jnp.mean(lse - y_pre[jnp.arange(N), y_true])
    # Loose tolerance only to stay robust if the compiler downgrades the f32
    # identity-matmul precision; the bf16 test below checks the math to 1e-4.
    assert jnp.allclose(loss, ref, atol=1e-2, rtol=1e-2), (loss, ref)

    # --- Multi-tile + ragged tail (1000 = 3*256 + 232) + bf16 inputs. --------
    N2 = 1000
    y_pre2 = jax.random.normal(k3, (N2, C), dtype=jnp.float32).astype(jnp.bfloat16)
    y_true2 = jax.random.randint(k4, (N2,), 0, C, dtype=jnp.int32)

    loss2 = cross_entropy_loss(y_pre2, y_true2, tile_n=256)  # grid=(4,), masked tail
    jax.block_until_ready(loss2)

    y2_f32 = y_pre2.astype(jnp.float32)
    lse2 = jax.scipy.special.logsumexp(y2_f32, axis=-1)
    ref2 = jnp.mean(lse2 - y2_f32[jnp.arange(N2), y_true2])
    assert jnp.allclose(loss2, ref2, atol=1e-4, rtol=1e-4), (loss2, ref2)

    print("KERNEL_OK")
</pallas_src>

<mosaic_0001>
module attributes {stable_mosaic.version = 11 : i64} {
  func.func @_ce_kernel(%arg0: i32, %arg1: memref<8x10xf32, #tpu.memory_space<vmem>>, %arg2: memref<1x8xi32, #tpu.memory_space<vmem>>, %arg3: memref<1x128xf32, #tpu.memory_space<vmem>>) attributes {dimension_semantics = [#tpu.dimension_semantics<parallel>], iteration_bounds = array<i64: 1>, scalar_prefetch = 0 : i64, scratch_operands = 0 : i64, tpu.core_type = #tpu.core_type<tc>, window_params = [{transform_indices = @transform_0, window_bounds = array<i64: 8, 10>}, {transform_indices = @transform_1, window_bounds = array<i64: 1, 8>}, {transform_indices = @transform_2, window_bounds = array<i64: 1, 128>}]} {
    %c0 = arith.constant 0 : index
    %c0_0 = arith.constant 0 : index
    %0 = vector.load %arg1[%c0, %c0_0] : memref<8x10xf32, #tpu.memory_space<vmem>>, vector<8x10xf32>
    %c0_1 = arith.constant 0 : index
    %c0_2 = arith.constant 0 : index
    %1 = vector.load %arg2[%c0_1, %c0_2] : memref<1x8xi32, #tpu.memory_space<vmem>>, vector<1x8xi32>
    %2 = tpu.iota {dimensions = array<i32: 0>} : vector<10x10xi32>
    %3 = tpu.iota {dimensions = array<i32: 1>} : vector<10x10xi32>
    %4 = arith.cmpi eq, %2, %3 : vector<10x10xi32>
    %5 = arith.extui %4 : vector<10x10xi1> to vector<10x10xi32>
    %6 = arith.sitofp %5 : vector<10x10xi32> to vector<10x10xf32>
    %cst = arith.constant dense<0.000000e+00> : vector<10x8xf32>
    %7 = tpu.matmul %6, %0, %cst {dimension_numbers = #tpu.dot_dimension_numbers<[1], [1], [0], [0], [0, 0, 1, 0], [], []>, precision = #tpu.contract_precision<fp32>} : vector<10x10xf32>, vector<8x10xf32>, vector<10x8xf32> -> vector<10x8xf32>
    %cst_3 = arith.constant dense<0xFF800000> : vector<8xf32>
    %8 = vector.multi_reduction <maximumf>, %7, %cst_3 [0] : vector<10x8xf32> to vector<8xf32>
    %9 = vector.shape_cast %8 : vector<8xf32> to vector<1x8xf32>
    %10 = vector.broadcast %9 : vector<1x8xf32> to vector<10x8xf32>
    %11 = arith.subf %7, %10 : vector<10x8xf32>
    %12 = math.exp %11 : vector<10x8xf32>
    %cst_4 = arith.constant dense<0.000000e+00> : vector<8xf32>
    %13 = vector.multi_reduction <add>, %12, %cst_4 [0] : vector<10x8xf32> to vector<8xf32>
    %14 = vector.shape_cast %13 : vector<8xf32> to vector<1x8xf32>
    %15 = tpu.iota {dimensions = array<i32: 0>} : vector<10x8xi32>
    %16 = vector.broadcast %1 : vector<1x8xi32> to vector<10x8xi32>
    %17 = arith.cmpi eq, %15, %16 : vector<10x8xi32>
    %cst_5 = arith.constant 0.000000e+00 : f32
    %18 = vector.broadcast %cst_5 : f32 to vector<10x8xf32>
    %19 = arith.select %17, %11, %18 : vector<10x8xi1>, vector<10x8xf32>
    %cst_6 = arith.constant dense<0.000000e+00> : vector<8xf32>
    %20 = vector.multi_reduction <add>, %19, %cst_6 [0] : vector<10x8xf32> to vector<8xf32>
    %21 = vector.shape_cast %20 : vector<8xf32> to vector<1x8xf32>
    %22 = math.log %14 : vector<1x8xf32>
    %23 = arith.subf %22, %21 : vector<1x8xf32>
    %c8_i32 = arith.constant 8 : i32
    %24 = arith.muli %arg0, %c8_i32 : i32
    %25 = tpu.iota {dimensions = array<i32: 1>} : vector<1x8xi32>
    %26 = vector.broadcast %24 : i32 to vector<1x8xi32>
    %27 = arith.addi %26, %25 : vector<1x8xi32>
    %c8_i32_7 = arith.constant 8 : i32
    %28 = vector.broadcast %c8_i32_7 : i32 to vector<1x8xi32>
    %29 = arith.cmpi slt, %27, %28 : vector<1x8xi32>
    %cst_8 = arith.constant 0.000000e+00 : f32
    %30 = vector.broadcast %cst_8 : f32 to vector<1x8xf32>
    %31 = arith.select %29, %23, %30 : vector<1x8xi1>, vector<1x8xf32>
    %32 = vector.shape_cast %31 : vector<1x8xf32> to vector<1x1x8xf32>
    %cst_9 = arith.constant dense<0.000000e+00> : vector<1xf32>
    %33 = vector.multi_reduction <add>, %32, %cst_9 [1, 2] : vector<1x1x8xf32> to vector<1xf32>
    %34 = vector.shape_cast %33 : vector<1xf32> to vector<1x1x1xf32>
    %35 = vector.extract %34[0, 0, 0] : f32 from vector<1x1x1xf32>
    %36 = vector.broadcast %35 : f32 to vector<1x128xf32>
    %c0_10 = arith.constant 0 : index
    %c0_11 = arith.constant 0 : index
    %37 = vector.load %arg3[%c0_10, %c0_11] : memref<1x128xf32, #tpu.memory_space<vmem>>, vector<1x128xf32>
    tpu.vector_store %arg3[%c0_10, %c0_11], %36 {strides = array<i32>} : memref<1x128xf32, #tpu.memory_space<vmem>>, vector<1x128xf32>,
    return
  }
  func.func @transform_0(%arg0: i32) -> (i32, i32) {
    %c0_i32 = arith.constant 0 : i32
    %c0_i32_0 = arith.constant 0 : i32
    return %arg0, %c0_i32 : i32, i32
  }
  func.func @transform_1(%arg0: i32) -> (i32, i32) {
    %c0_i32 = arith.constant 0 : i32
    %c0_i32_0 = arith.constant 0 : i32
    return %c0_i32, %arg0 : i32, i32
  }
  func.func @transform_2(%arg0: i32) -> (i32, i32) {
    %c0_i32 = arith.constant 0 : i32
    %c0_i32_0 = arith.constant 0 : i32
    return %c0_i32, %arg0 : i32, i32
  }
}

</mosaic_0001>

<bundles_post_ra>
// kernel: tpu_custom_call.1
= control target key start
LH: loop header
LB: loop body
LE: loop exit
PB: predicated region body
PF: predicated region fallthrough
CT: control target
= control target key end

     0   :  { %7 = vsyncpa [#allocation3], 0  ;;  %s815_s0 = inlined_call_operand.hbm [shape: f32[8,10], index: 0, kind: input, shape index: {}]   ;;  %s816_s1 = inlined_call_operand.vmem [shape: s32[1,8], index: 1, kind: input, shape index: {}]   ;;  %s817_s2 = inlined_call_operand.hbm [shape: f32[1,128], index: 2, kind: output, shape index: {}]  }
   0x1   :  { %8 = vsyncpa [#allocation4], 0  ;;  %s741_s9 = smov [#allocation2]   ;;  %s693_s13 = scalar_lea.hbm %s815_s0, 128 }
   0x2   :  { %s15_s10 = sshll.u32 %s741_s9, 4  ;;  %p694_p0 = scmp.ne.s32.totalorder %s815_s0, %s693_s13  ;;  %s16_s10 = int_to_ptr.vmem [resolvable:$true] %s15_s10 }
   0x3   :  { %p697_p1 = scmp.lt.u32.totalorder %s693_s13, %s815_s0 }
   0x5   :  { %p699_p2 = pnand %p697_p1, %p694_p0 }
   0x7   :  { %702 = shalt.err (!%p699_p2)
}
   0x8   :  { %s703_s18 = scalar_lea.vmem %s16_s10, 128  ;;  %p708_p4 = scmp.lt.s32.totalorder %s16_s10, %s16_s10 }
   0x9   :  { %p704_p3 = scmp.ne.s32.totalorder %s16_s10, %s703_s18  ;;  %p709_p5 = scmp.lt.s32.totalorder %s703_s18, %s703_s18 }
   0xb   :  { %p710_p6 = por %p709_p5, %p708_p4 }
   0xd   :  { %p711_p7 = pnand %p710_p6, %p704_p3 }
   0xf   :  { %714 = shalt.err (!%p711_p7)
}
  0x10   :  { %18 = dma.hbm_to_vmem [thread:$0]  %s815_s0, 128, %s16_s10, [#allocation3]  }
  0x11   :  { %737 = dma.done.wait [#allocation3], 128  }
  0x12   :  { %738 = vsyncadd [#allocation3], 4294967168  ;;  %v26_v0 = vlaneseq  ;;  %vm37_vm0 = vcmask 80896   ;;  %v742_v4 = vmov 0.0   ;;  %v24_v7 = vld [vmem:[#allocation2] sm:$0xff]  ;;  %vm538_vm3 = vcmask 58368  }
  0x13   :  { %v45_v10 = vsel %vm37_vm0, %v24_v7, 0  ;;  %vm536_vm4 = vcmask 64512   ;;  %v623_v37 = vld [vmem:[%s816_s1] ss:$0 sm:$0xff]  ;;  %vm587_vm8 = vcmask 57344   ;;  %s743_s1 = smov [#allocation5]  }
  0x14   :  { %v771_v1 = vshrl.u32 %v26_v0, 7  ;;  %v773_v2 = vand.u32 127, %v26_v0  ;;  %v48_v12 = vand.u32 4294901760, %v45_v10  ;;  %s606_s22 = sshll.u32 %s743_s1, 4  ;;  %s607_s22 = int_to_ptr.vmem [resolvable:$true] %s606_s22 }
  0x15   :  { %s715_s24 = scalar_lea.vmem %s607_s22, 16  ;;  %s719_s25 = scalar_lea.vmem %s607_s22, 32 }
  0x16   :  { %v776_v3 = vadd.s32 8, %v771_v1  ;;  %vm31_vm1 = vcmp.eq.s32.totalorder %v771_v1, %v773_v2  ;;  %657 = vmatprep.subr.mxu0 %v48_v12  ;;  %642 = vmatprep.subr.mxu1 %v48_v12  ;;  %v135_v17 = vsub.f32 %v45_v10, %v48_v12  ;;  %vm566_vm5 = vcmp.eq.s32.totalorder %v771_v1, %v623_v37  ;;  %p716_p8 = scmp.ne.s32.totalorder %s607_s22, %s715_s24  ;;  %p720_p9 = scmp.lt.s32.totalorder %s607_s22, %s607_s22 }
  0x17   :  { %v615_v5 = vsel %vm31_vm1, 1.0, %v742_v4  ;;  %658 = vmatpush3.xpose.msra.mxu0 %v48_v12  ;;  %643 = vmatpush3.xpose.msra.mxu1 %v48_v12  ;;  %vm585_vm7 = vcmp.lt.s32.totalorder %v773_v2, 8  ;;  %p721_p10 = scmp.lt.s32.totalorder %s719_s25, %s715_s24 }
  0x18   :  { %vm32_vm2 = vcmp.eq.s32.totalorder %v776_v3, %v773_v2  ;;  %v39_v6 = vsel %vm37_vm0, %v615_v5, 0  ;;  %v136_v20 = vand.u32 4294901760, %v135_v17  ;;  %vm567_vm6 = vcmp.eq.s32.totalorder %v776_v3, %v623_v37 }
  0x19   :  { %v616_v8 = vsel %vm32_vm2, 1.0, %v742_v4  ;;  %v114_v9 = vsub.f32 %v39_v6, %v39_v6  ;;  %p722_p11 = por %p721_p10, %p720_p9 }
  0x1a   :  { %v42_v11 = vsel %vm37_vm0, %v616_v8, 0  ;;  %v137_v22 = vsub.f32 %v135_v17, %v136_v20  ;;  %662 = vmatprep.subr.mxu0 %v136_v20 }
  0x1b   :  { %v115_v13 = vand.u32 4294901760, %v114_v9  ;;  %v124_v14 = vsub.f32 %v42_v11, %v42_v11  ;;  %p723_p12 = pnand %p722_p11, %p716_p8 }
  0x1c   :  { %v138_v23 = vand.u32 4294901760, %v137_v22 }
  0x1d   :  { %v125_v15 = vand.u32 4294901760, %v124_v14  ;;  %v116_v16 = vsub.f32 %v114_v9, %v115_v13  ;;  %659 = vmatprep.mubr.f32.mxu0 %v115_v13 }
  0x1e   :  { %647 = vmatprep.subr.mxu1 %v138_v23 }
  0x1f   :  { %v117_v18 = vand.u32 4294901760, %v116_v16  ;;  %v126_v19 = vsub.f32 %v124_v14, %v125_v15  ;;  %660 = vmatmul.mubr.f32.vlgmr.msra.gmra.mrb[0].mxu0 %v125_v15 }
  0x20   :  { %664 = vmatprep.mubr.msk.f32.mxu0 %vm37_vm0, %v615_v5  ;;  %663 = vmatpush3.xpose.msra.mxu0 %v136_v20 }
  0x21   :  { %644 = vmatprep.mubr.f32.mxu1 %v117_v18  ;;  %v127_v21 = vand.u32 4294901760, %v126_v19  ;;  %667 = vmatprep.subr.mxu0 %v48_v12 }
  0x23   :  { %645 = vmatmul.mubr.f32.vlgmr.msra.gmra.mrb[0].mxu1 %v127_v21 }
  0x24   :  { %649 = vmatprep.mubr.msk.f32.mxu1 %vm37_vm0, %v615_v5  ;;  %648 = vmatpush3.xpose.msra.mxu1 %v138_v23 }
  0x25   :  { %652 = vmatprep.subr.mxu1 %v135_v17 }
  0x27   :  { %665 = vmatmul.mubr.msk.f32.vlgmr.msra.gmra.mrb[0].mxu0 %vm37_vm0, %v616_v8 }
  0x28   :  { %668 = vmatpush3.xpose.msra.mxu0 %v48_v12  ;;  %669 = vmatprep.mubr.msk.f32.mxu0 %vm37_vm0, %v615_v5 }
  0x2b   :  { %650 = vmatmul.mubr.msk.f32.vlgmr.msra.gmra.mrb[0].mxu1 %vm37_vm0, %v616_v8 }
  0x2c   :  { %653 = vmatpush3.xpose.msra.mxu1 %v135_v17  ;;  %654 = vmatprep.mubr.f32.mxu1 %v114_v9 }
  0x2f   :  { %670 = vmatmul.mubr.msk.f32.vlgmr.msra.gmra.mrb[0].mxu0 %vm37_vm0, %v616_v8 }
  0x33   :  { %655 = vmatmul.mubr.f32.vlgmr.msra.gmra.mrb[0].mxu1 %v124_v14 }
 0x102   :  { %v671_v24 = vpop.f32.mrb[0].mxu0 }
 0x103   :  { %v526_v25 = vpop.f32.mrb[1].mxu0 }
 0x106   :  { %v656_v26 = vpop.f32.mrb[0].mxu1 }
 0x107   :  { %v672_v27 = vadd.f32 %v671_v24, %v656_v26  ;;  %v285_v28 = vpop.f32.mrb[1].mxu1 }
 0x108   :  { %v673_v29 = vadd.f32 %v526_v25, %v285_v28 }
 0x109   :  { %v539_v30 = vsel %vm538_vm3, %v672_v27, -inf }
 0x10a   :  { %v537_v31 = vsel %vm536_vm4, %v673_v29, -inf }
 0x10b   :  { %v540_v32 = vmax.f32 %v537_v31, %v539_v30 }
 0x10d   :  { %v541_v33 = vrot.slane %v540_v32, 4 }
 0x10f   :  { %v542_v34 = vmax.f32 %v540_v32, %v541_v33 }
 0x111   :  { %v543_v35 = vrot.slane %v542_v34, 2 }
 0x113   :  { %v544_v36 = vmax.f32 %v542_v34, %v543_v35 }
 0x115   :  { %v545_v38 = vrot.slane %v544_v36, 1 }
 0x117   :  { %v546_v39 = vmax.f32 %v544_v36, %v545_v38 }
 0x119   :  { %v547_v40 = vsub.f32 %v673_v29, %v546_v39  ;;  %v548_v41 = vsub.f32 %v672_v27, %v546_v39 }
 0x11b   :  { %v549_v42 = vmul.f32 1.442695, %v547_v40  ;;  %v551_v43 = vmul.f32 1.442695, %v548_v41  ;;  %v568_v44 = vsel %vm566_vm5, %v547_v40, 0.0  ;;  %v569_v45 = vsel %vm567_vm6, %v548_v41, 0.0 }
 0x11c   :  { %v570_v46 = vsel %vm536_vm4, %v568_v44, 0.0  ;;  %v571_v47 = vsel %vm538_vm3, %v569_v45, 0.0 }
 0x11d   :  { %687 = vpow2.f32 %v549_v42  ;;  %v572_v48 = vadd.f32 %v571_v47, %v570_v46 }
 0x11e   :  { %689 = vpow2.f32 %v551_v43 }
 0x11f   :  { %v573_v56 = vrot.slane %v572_v48, 4 }
 0x121   :  { %v574_v59 = vadd.f32 %v573_v56, %v572_v48 }
 0x123   :  { %v575_v62 = vrot.slane %v574_v59, 2 }
 0x125   :  { %v576_v63 = vadd.f32 %v575_v62, %v574_v59 }
 0x127   :  { %v688_v49 = vpop.eup %687  ;;  %v577_v0 = vrot.slane %v576_v63, 1 }
 0x128   :  { %v690_v50 = vpop.eup %689  ;;  %v553_v51 = vsel %vm536_vm4, %v688_v49, 0.0 }
 0x129   :  { %v554_v52 = vsel %vm538_vm3, %v690_v50, 0.0  ;;  %v578_v3 = vadd.f32 %v577_v0, %v576_v63 }
 0x12a   :  { %v555_v53 = vadd.f32 %v554_v52, %v553_v51 }
 0x12c   :  { %v556_v54 = vrot.slane %v555_v53, 4 }
 0x12e   :  { %v557_v55 = vadd.f32 %v556_v54, %v555_v53 }
 0x130   :  { %v558_v57 = vrot.slane %v557_v55, 2 }
 0x132   :  { %v559_v58 = vadd.f32 %v558_v57, %v557_v55 }
 0x134   :  { %v560_v60 = vrot.slane %v559_v58, 1 }
 0x136   :  { %v561_v61 = vadd.f32 %v560_v60, %v559_v58 }
 0x138   :  { %691 = vlog2.f32 %v561_v61 }
 0x142   :  { %v692_v1 = vpop.eup %691 }
 0x143   :  { %v580_v4 = vmul.f32 0.6931472, %v692_v1 }
 0x145   :  { %v581_v5 = vsub.f32 %v580_v4, %v578_v3 }
 0x147   :  { %v586_v6 = vsel %vm585_vm7, %v581_v5, 0.0 }
 0x148   :  { %v588_v7 = vsel %vm587_vm8, %v586_v6, 0.0 }
 0x149   :  { %589 = vadd.xlane.f32.xlu0 %v588_v7 }
 0x1d6   :  { %v590_v8 = vpop.xlane.xlu0 %589 }
 0x1d7   :  { %v591_v9 = vrot.slane %v590_v8, 4 }
 0x1d9   :  { %v592_v10 = vadd.f32 %v591_v9, %v590_v8 }
 0x1db   :  { %v593_v11 = vrot.slane %v592_v10, 2 }
 0x1dd   :  { %v594_v12 = vadd.f32 %v593_v11, %v592_v10 }
 0x1df   :  { %v595_v13 = vrot.slane %v594_v12, 1 }
 0x1e1   :  { %v596_v14 = vadd.f32 %v595_v13, %v594_v12 }
 0x1e3   :  { %682 = vpush %v596_v14 }
 0x214   :  { %s683_s23 = spop %682 }
 0x215   :  { %v598_v15 = vstv %s683_s23 }
 0x216   :  { %599 = vst [vmem:[#allocation5] sm:$0x1] %v598_v15 }
 0x217   :  { %726 = shalt.err (!%p723_p12)
}
 0x218   :  { %s727_s28 = scalar_lea.hbm %s817_s2, 16 }
 0x219   :  { %p728_p13 = scmp.ne.s32.totalorder %s817_s2, %s727_s28  ;;  %p731_p0 = scmp.lt.u32.totalorder %s727_s28, %s817_s2 }
 0x21b   :  { %p733_p1 = pnand %p731_p0, %p728_p13 }
 0x21d   :  { %736 = shalt.err (!%p733_p1)
}
 0x21e   :  { %609 = dma.vmem_to_hbm [thread:$0]  %s607_s22, 16, %s817_s2, [#allocation4]  }
 0x21f   :  { %739 = dma.done.wait [#allocation4], 16  }
 0x220   :  { %740 = vsyncadd [#allocation4], 4294967280 }
 0x221   :  { %613 = vsyncpa [#allocation3], 1 }
 0x222   :  { %614 = vsyncpa [#allocation4], 1 }

</bundles_post_ra>
